<compile_context>
chip_gen: v7x
topology: tpu7x:2x2x1
jax: 0.10.0
libtpu: 0.0.40
codegen_flags: <defaults>
</compile_context>

<pallas_src>
import functools

import jax
import jax.numpy as jnp
from jax import lax
from jax.experimental import pallas as pl
from jax.experimental.pallas import tpu as pltpu

LANE = 128  # lane width: per-gate hidden padding and packed-feature padding


def _lstm_seq_kernel(wx_ref, wh_ref, xseq_ref, h0_ref, c0_ref, out_ref, zx_scr):
    """Runs T LSTM-cell steps; weights stay VMEM-resident, state lives in vregs.

    wx_ref:   (LANE, 4*LANE) bf16.  Rows = packed input features
              [x (0:I) | 1.0 bias row (I) | zeros]; columns = gates [i|f|g|o],
              each padded to LANE lanes.  i/f/o columns (incl. bias) are
              pre-scaled by 0.5 (tanh-sigmoid identity).
    wh_ref:   (LANE, 4*LANE) bf16.  Rows = h features [h (0:H) | zeros], same
              column layout / 0.5 pre-scale as wx_ref.
    xseq_ref: (T, LANE)  bf16 packed x rows: x_t in lanes [0:I], 1.0 at lane I.
    h0_ref:   (1, LANE)  f32 initial h in lanes [0:H], zeros past H.
    c0_ref:   (1, LANE)  f32 initial c in lanes [0:H], zeros past H.
    out_ref:  (1, 1)     f32 sum(c_T + h_T).
    zx_scr:   (T, 4*LANE) f32 scratch holding the hoisted x-projection.
    """
    T = xseq_ref.shape[0]

    # Hoisted, batched x-projection (+ folded biases): one full-width MXU call
    # for all timesteps, off the serial recurrence.
    zx_scr[...] = jnp.dot(xseq_ref[...], wx_ref[...],
                          preferred_element_type=jnp.float32)

    def step(t, carry):
        h, c = carry                                               # f32 (1, LANE)
        # Tiny recurrent projection: bf16 operands, f32 accumulate.
        zh = jnp.dot(h.astype(jnp.bfloat16), wh_ref[...],
                     preferred_element_type=jnp.float32)           # (1, 4*LANE)
        z = zx_scr[pl.ds(t, 1), :] + zh                            # (1, 4*LANE)
        # One tanh over the whole z row; σ(a) = 0.5*tanh(a/2) + 0.5 with the
        # 0.5 argument scale already folded into the i/f/o weight columns.
        tz = jnp.tanh(z)
        i = 0.5 * tz[:, 0 * LANE:1 * LANE] + 0.5
        f = 0.5 * tz[:, 1 * LANE:2 * LANE] + 0.5
        g = tz[:, 2 * LANE:3 * LANE]
        o = 0.5 * tz[:, 3 * LANE:4 * LANE] + 0.5
        # Padded lanes: z == 0 there -> i=f=o=0.5, g=0; c,h start at 0 in those
        # lanes so they remain exactly 0 through the whole recurrence.
        c_next = f * c + i * g
        h_next = o * jnp.tanh(c_next)
        return h_next, c_next

    unroll = True if T <= 64 else 8
    h_fin, c_fin = lax.fori_loop(0, T, step, (h0_ref[...], c0_ref[...]),
                                 unroll=unroll)
    out_ref[...] = jnp.sum(c_fin + h_fin, keepdims=True)           # (1, 1)


def pack_lstm_weights(w_ih, w_hh, b_ih, b_hh):
    """One-time packing of the fused, transposed, bias-folded weight slabs.

    Returns (wx_slab, wh_slab), each (LANE, 4*LANE) bf16.  The 0.5 argument
    scale of σ(a) = 0.5*(1 + tanh(a/2)) is folded into the i/f/o columns (and
    their bias entries) so the kernel needs only one tanh per z row.
    """
    H4, I = w_ih.shape
    H = H4 // 4
    assert 4 * H == H4
    assert H <= LANE and I + 1 <= LANE, (
        "hidden/input too large for single-lane-row packing")
    gate_scale = (0.5, 0.5, 1.0, 0.5)                          # gates [i, f, g, o]
    b = (b_ih + b_hh).astype(jnp.float32).reshape(4, H)        # [gate, unit]
    w_hh_g = w_hh.astype(jnp.float32).reshape(4, H, H)         # [gate, unit, h-feat]
    w_ih_g = w_ih.astype(jnp.float32).reshape(4, H, I)         # [gate, unit, x-feat]
    wx = jnp.zeros((LANE, 4 * LANE), jnp.float32)
    wh = jnp.zeros((LANE, 4 * LANE), jnp.float32)
    for k in range(4):
        c0, s = k * LANE, gate_scale[k]
        wx = wx.at[0:I, c0:c0 + H].set(s * jnp.transpose(w_ih_g[k]))   # x features
        wx = wx.at[I, c0:c0 + H].set(s * b[k])                         # bias row
        wh = wh.at[0:H, c0:c0 + H].set(s * jnp.transpose(w_hh_g[k]))   # h features
    return wx.astype(jnp.bfloat16), wh.astype(jnp.bfloat16)


@functools.partial(jax.jit, static_argnames=("input_size", "hidden_size"))
def allstm_forward(wx_slab, wh_slab, x_seq, h0, c0, *, input_size, hidden_size):
    """Runs the LSTM cell over x_seq (T, I, 1); returns sum(c_T + h_T)."""
    I, H = input_size, hidden_size
    T = x_seq.shape[0]
    # TODO(synk): for very long sequences (T ~ tens of thousands) chunk the T
    # axis with a grid / BlockSpec (and, with batching, a leading 'parallel'
    # axis for v7x's two TensorCores); at these shapes every buffer is a few
    # KiB so whole-array VMEM residency is fine on all generations.
    xs = jnp.zeros((T, LANE), jnp.float32)
    xs = xs.at[:, 0:I].set(x_seq[:, :, 0].astype(jnp.float32))
    xs = xs.at[:, I].set(1.0)                                  # bias lane
    xs = xs.astype(jnp.bfloat16)
    h0p = jnp.zeros((1, LANE), jnp.float32).at[0, :H].set(h0[:, 0].astype(jnp.float32))
    c0p = jnp.zeros((1, LANE), jnp.float32).at[0, :H].set(c0[:, 0].astype(jnp.float32))

    vmem = pl.BlockSpec(memory_space=pltpu.MemorySpace.VMEM)
    out = pl.pallas_call(
        _lstm_seq_kernel,
        out_shape=jax.ShapeDtypeStruct((1, 1), jnp.float32),
        in_specs=[vmem, vmem, vmem, vmem, vmem],
        out_specs=vmem,
        scratch_shapes=[pltpu.VMEM((T, 4 * LANE), jnp.float32)],  # hoisted x-proj
    )(wx_slab, wh_slab, xs, h0p, c0p)
    return out[0, 0]


def _reference_forward(w_ih, w_hh, b_ih, b_hh, x_seq, h0, c0):
    H = h0.shape[0]
    h, c = h0, c0
    for t in range(x_seq.shape[0]):
        z = w_ih @ x_seq[t] + b_ih + w_hh @ h + b_hh
        i = jax.nn.sigmoid(z[0 * H:1 * H])
        f = jax.nn.sigmoid(z[1 * H:2 * H])
        g = jnp.tanh(z[2 * H:3 * H])
        o = jax.nn.sigmoid(z[3 * H:4 * H])
        c = f * c + i * g
        h = o * jnp.tanh(c)
    return jnp.sum(c + h)


if __name__ == "__main__":
    input_size, hidden_size = 3, 2

    key = jax.random.PRNGKey(0)
    k_wih, k_whh, k_bih, k_bhh, k_x, k_h, k_c = jax.random.split(key, 7)

    # Parameters mirror LSTMCell.__init__ (gate order [i, f, g, o] along 4H);
    # small nonzero biases exercise the bias-folding path.
    w_ih = jax.random.normal(k_wih, (4 * hidden_size, input_size), jnp.float32)
    w_hh = jax.random.normal(k_whh, (4 * hidden_size, hidden_size), jnp.float32)
    b_ih = 0.1 * jax.random.normal(k_bih, (4 * hidden_size, 1), jnp.float32)
    b_hh = 0.1 * jax.random.normal(k_bhh, (4 * hidden_size, 1), jnp.float32)

    wx_slab, wh_slab = pack_lstm_weights(w_ih, w_hh, b_ih, b_hh)  # packed once

    # bf16 MXU operands (per perf review) shift results at the ~1e-2 level at
    # these magnitudes; the math (tanh-sigmoid identity) is exact, so a modest
    # tolerance covers only the dtype change.
    RTOL = ATOL = 2e-2

    # 1) Single-step case: exactly the module's forward(x_t, (h_prev, c_prev)).
    x = jax.random.normal(k_x, (1, input_size, 1), jnp.float32)
    h_prev = jnp.zeros((hidden_size, 1), jnp.float32)
    c_prev = jnp.zeros((hidden_size, 1), jnp.float32)

    out = allstm_forward(wx_slab, wh_slab, x, h_prev, c_prev,
                         input_size=input_size, hidden_size=hidden_size)
    out = jax.block_until_ready(out)
    ref = _reference_forward(w_ih, w_hh, b_ih, b_hh, x, h_prev, c_prev)
    assert jnp.allclose(out, ref, rtol=RTOL, atol=ATOL), (out, ref)

    # 2) Fused-recurrence case (same kernel; weight slabs stay VMEM-resident,
    #    h/c carried in vregs): an 8-step sequence with nonzero initial state.
    seq_len = 8
    x_seq = jax.random.normal(k_x, (seq_len, input_size, 1), jnp.float32)
    h0 = 0.5 * jax.random.normal(k_h, (hidden_size, 1), jnp.float32)
    c0 = 0.5 * jax.random.normal(k_c, (hidden_size, 1), jnp.float32)

    out_seq = allstm_forward(wx_slab, wh_slab, x_seq, h0, c0,
                             input_size=input_size, hidden_size=hidden_size)
    out_seq = jax.block_until_ready(out_seq)
    ref_seq = _reference_forward(w_ih, w_hh, b_ih, b_hh, x_seq, h0, c0)
    assert jnp.allclose(out_seq, ref_seq, rtol=RTOL, atol=ATOL), (out_seq, ref_seq)

    # TODO(synk): the @al.grad backward pass of ALLSTMCell is not implemented
    # here (forward only).
    print("KERNEL_OK")
</pallas_src>

<mosaic_0001>
module attributes {stable_mosaic.version = 11 : i64} {
  func.func @_lstm_seq_kernel(%arg0: memref<128x512xbf16, #tpu.memory_space<vmem>>, %arg1: memref<128x512xbf16, #tpu.memory_space<vmem>>, %arg2: memref<1x128xbf16, #tpu.memory_space<vmem>>, %arg3: memref<1x128xf32, #tpu.memory_space<vmem>>, %arg4: memref<1x128xf32, #tpu.memory_space<vmem>>, %arg5: memref<1x1xf32, #tpu.memory_space<vmem>>, %arg6: memref<1x512xf32, #tpu.memory_space<vmem>>) attributes {dimension_semantics = [], scalar_prefetch = 0 : i64, scratch_operands = 1 : i64, tpu.core_type = #tpu.core_type<tc>} {
    %c0 = arith.constant 0 : index
    %c0_0 = arith.constant 0 : index
    %0 = vector.load %arg2[%c0, %c0_0] : memref<1x128xbf16, #tpu.memory_space<vmem>>, vector<1x128xbf16>
    %c0_1 = arith.constant 0 : index
    %c0_2 = arith.constant 0 : index
    %1 = vector.load %arg0[%c0_1, %c0_2] : memref<128x512xbf16, #tpu.memory_space<vmem>>, vector<128x512xbf16>
    %cst = arith.constant dense<0.000000e+00> : vector<1x512xf32>
    %2 = tpu.matmul %0, %1, %cst {dimension_numbers = #tpu.dot_dimension_numbers<[1], [0], [0], [1], [0, 0, 1, 1], [], []>} : vector<1x128xbf16>, vector<128x512xbf16>, vector<1x512xf32> -> vector<1x512xf32>
    %c0_3 = arith.constant 0 : index
    %c0_4 = arith.constant 0 : index
    %3 = vector.load %arg6[%c0_3, %c0_4] : memref<1x512xf32, #tpu.memory_space<vmem>>, vector<1x512xf32>
    tpu.vector_store %arg6[%c0_3, %c0_4], %2 {strides = array<i32>} : memref<1x512xf32, #tpu.memory_space<vmem>>, vector<1x512xf32>,
    %c0_5 = arith.constant 0 : index
    %c0_6 = arith.constant 0 : index
    %4 = vector.load %arg3[%c0_5, %c0_6] : memref<1x128xf32, #tpu.memory_space<vmem>>, vector<1x128xf32>
    %c0_7 = arith.constant 0 : index
    %c0_8 = arith.constant 0 : index
    %5 = vector.load %arg4[%c0_7, %c0_8] : memref<1x128xf32, #tpu.memory_space<vmem>>, vector<1x128xf32>
    %c0_i32 = arith.constant 0 : i32
    %6 = arith.truncf %4 : vector<1x128xf32> to vector<1x128xbf16>
    %c0_9 = arith.constant 0 : index
    %c0_10 = arith.constant 0 : index
    %7 = vector.load %arg1[%c0_9, %c0_10] : memref<128x512xbf16, #tpu.memory_space<vmem>>, vector<128x512xbf16>
    %cst_11 = arith.constant dense<0.000000e+00> : vector<1x512xf32>
    %8 = tpu.matmul %6, %7, %cst_11 {dimension_numbers = #tpu.dot_dimension_numbers<[1], [0], [0], [1], [0, 0, 1, 1], [], []>} : vector<1x128xbf16>, vector<128x512xbf16>, vector<1x512xf32> -> vector<1x512xf32>
    %9 = arith.index_cast %c0_i32 : i32 to index
    %c0_12 = arith.constant 0 : index
    %10 = vector.load %arg6[%9, %c0_12] : memref<1x512xf32, #tpu.memory_space<vmem>>, vector<1x512xf32>
    %11 = arith.addf %10, %8 : vector<1x512xf32>
    %12 = math.tanh %11 : vector<1x512xf32>
    %13 = vector.extract_strided_slice %12 {offsets = [0, 0], sizes = [1, 128], strides = [1, 1]} : vector<1x512xf32> to vector<1x128xf32>
    %cst_13 = arith.constant 5.000000e-01 : f32
    %14 = vector.broadcast %cst_13 : f32 to vector<1x128xf32>
    %15 = arith.mulf %14, %13 : vector<1x128xf32>
    %cst_14 = arith.constant 5.000000e-01 : f32
    %16 = vector.broadcast %cst_14 : f32 to vector<1x128xf32>
    %17 = arith.addf %15, %16 : vector<1x128xf32>
    %18 = vector.extract_strided_slice %12 {offsets = [0, 128], sizes = [1, 128], strides = [1, 1]} : vector<1x512xf32> to vector<1x128xf32>
    %cst_15 = arith.constant 5.000000e-01 : f32
    %19 = vector.broadcast %cst_15 : f32 to vector<1x128xf32>
    %20 = arith.mulf %19, %18 : vector<1x128xf32>
    %cst_16 = arith.constant 5.000000e-01 : f32
    %21 = vector.broadcast %cst_16 : f32 to vector<1x128xf32>
    %22 = arith.addf %20, %21 : vector<1x128xf32>
    %23 = vector.extract_strided_slice %12 {offsets = [0, 256], sizes = [1, 128], strides = [1, 1]} : vector<1x512xf32> to vector<1x128xf32>
    %24 = vector.extract_strided_slice %12 {offsets = [0, 384], sizes = [1, 128], strides = [1, 1]} : vector<1x512xf32> to vector<1x128xf32>
    %cst_17 = arith.constant 5.000000e-01 : f32
    %25 = vector.broadcast %cst_17 : f32 to vector<1x128xf32>
    %26 = arith.mulf %25, %24 : vector<1x128xf32>
    %cst_18 = arith.constant 5.000000e-01 : f32
    %27 = vector.broadcast %cst_18 : f32 to vector<1x128xf32>
    %28 = arith.addf %26, %27 : vector<1x128xf32>
    %29 = arith.mulf %22, %5 : vector<1x128xf32>
    %30 = arith.mulf %17, %23 : vector<1x128xf32>
    %31 = arith.addf %29, %30 : vector<1x128xf32>
    %32 = math.tanh %31 : vector<1x128xf32>
    %33 = arith.mulf %28, %32 : vector<1x128xf32>
    %c1_i32 = arith.constant 1 : i32
    %34 = arith.addf %31, %33 : vector<1x128xf32>
    %35 = vector.shape_cast %34 : vector<1x128xf32> to vector<1x1x128xf32>
    %cst_19 = arith.constant dense<0.000000e+00> : vector<1xf32>
    %36 = vector.multi_reduction <add>, %35, %cst_19 [1, 2] : vector<1x1x128xf32> to vector<1xf32>
    %37 = vector.shape_cast %36 : vector<1xf32> to vector<1x1x1xf32>
    %38 = vector.extract %37[0, 0, 0] : f32 from vector<1x1x1xf32>
    %39 = vector.broadcast %38 : f32 to vector<1x1xf32>
    %c0_20 = arith.constant 0 : index
    %c0_21 = arith.constant 0 : index
    %40 = vector.load %arg5[%c0_20, %c0_21] : memref<1x1xf32, #tpu.memory_space<vmem>>, vector<1x1xf32>
    tpu.vector_store %arg5[%c0_20, %c0_21], %39 {strides = array<i32>} : memref<1x1xf32, #tpu.memory_space<vmem>>, vector<1x1xf32>,
    return
  }
}

</mosaic_0001>

<bundles_post_ra>
// kernel: allstm_forward.1
= control target key start
LH: loop header
LB: loop body
LE: loop exit
PB: predicated region body
PF: predicated region fallthrough
CT: control target
= control target key end

     0   :  { %10 = vsyncpa [#allocation4], 0  ;;  %s1048_s0 = inlined_call_operand.hbm [shape: bf16[128,512], index: 0, kind: input, shape index: {}]   ;;  %s1049_s1 = inlined_call_operand.hbm [shape: bf16[128,512], index: 1, kind: input, shape index: {}]   ;;  %s1050_s2 = inlined_call_operand.vmem [shape: bf16[1,128], index: 2, kind: input, shape index: {}]   ;;  %s1051_s3 = inlined_call_operand.vmem [shape: f32[1,128], index: 3, kind: input, shape index: {}]   ;;  %s1052_s4 = inlined_call_operand.vmem [shape: f32[1,128], index: 4, kind: input, shape index: {}]   ;;  %s1053_s5 = inlined_call_operand.hbm [shape: f32[1,1], index: 5, kind: output, shape index: {}]  }
   0x1   :  { %11 = vsyncpa [#allocation7], 0 }
   0x2   :  { %12 = vsyncpa [#allocation5], 0  ;;  %s962_s18 = smov [#allocation3]   ;;  %s890_s22 = scalar_lea.hbm %s1048_s0, 4096 }
   0x3   :  { %s18_s19 = sshll.u32 %s962_s18, 4  ;;  %p891_p0 = scmp.ne.s32.totalorder %s1048_s0, %s890_s22  ;;  %s19_s19 = int_to_ptr.vmem [resolvable:$true] %s18_s19 }
   0x4   :  { %p894_p1 = scmp.lt.u32.totalorder %s890_s22, %s1048_s0 }
   0x6   :  { %p896_p2 = pnand %p894_p1, %p891_p0 }
   0x8   :  { %899 = shalt.err (!%p896_p2)
}
   0x9   :  { %s900_s27 = scalar_lea.vmem %s19_s19, 4096  ;;  %p905_p4 = scmp.lt.s32.totalorder %s19_s19, %s19_s19 }
   0xa   :  { %p901_p3 = scmp.ne.s32.totalorder %s19_s19, %s900_s27  ;;  %p906_p5 = scmp.lt.s32.totalorder %s900_s27, %s900_s27 }
   0xc   :  { %p907_p6 = por %p906_p5, %p905_p4 }
   0xe   :  { %p908_p7 = pnand %p907_p6, %p901_p3 }
  0x10   :  { %911 = shalt.err (!%p908_p7)
}
  0x11   :  { %s963_s28 = smov 256   ;;  %s964_s29 = smov 16  }
  0x12   :  { %24 = dma.hbm_to_vmem [thread:$0]  %s1048_s0, 4096, %s19_s19, [#allocation4], %s963_s28, %s963_s28, %s964_s29  }
  0x13   :  { %s965_s7 = smov [#allocation6]   ;;  %s912_s11 = scalar_lea.hbm %s1049_s1, 4096 }
  0x14   :  { %s30_s8 = sshll.u32 %s965_s7, 4  ;;  %p913_p8 = scmp.ne.s32.totalorder %s1049_s1, %s912_s11  ;;  %s31_s8 = int_to_ptr.vmem [resolvable:$true] %s30_s8 }
  0x15   :  { %p916_p9 = scmp.lt.u32.totalorder %s912_s11, %s1049_s1 }
  0x17   :  { %p918_p10 = pnand %p916_p9, %p913_p8 }
  0x19   :  { %921 = shalt.err (!%p918_p10)
}
  0x1a   :  { %s922_s16 = scalar_lea.vmem %s31_s8, 4096  ;;  %p927_p12 = scmp.lt.s32.totalorder %s31_s8, %s31_s8 }
  0x1b   :  { %p923_p11 = scmp.ne.s32.totalorder %s31_s8, %s922_s16  ;;  %p928_p13 = scmp.lt.s32.totalorder %s922_s16, %s922_s16 }
  0x1d   :  { %p929_p0 = por %p928_p13, %p927_p12 }
  0x1f   :  { %p930_p1 = pnand %p929_p0, %p923_p11 }
  0x21   :  { %933 = shalt.err (!%p930_p1)
}
  0x22   :  { %36 = dma.hbm_to_vmem [thread:$0]  %s1049_s1, 4096, %s31_s8, [#allocation7], %s963_s28, %s963_s28, %s964_s29  }
  0x23   :  { %956 = dma.done.wait [#allocation4], 4096  }
  0x24   :  { %957 = vsyncadd [#allocation4], 4294963200 }
  0x25   :  { %958 = dma.done.wait [#allocation7], 4096  }
  0x26   :  { %959 = vsyncadd [#allocation7], 4294963200  ;;  %v966_v0 = vmov 0   ;;  %v790_v1 = vld [vmem:[#allocation3 + $0x4] ss:$16 sps:$4 sm:$0xff]   ;;  %vm687_vm1 = vcmask 1040384  }
  0x27   :  { %275 = vmatprep.mubr.bf16.mxu0 %v966_v0  ;;  %316 = vmatprep.mubr.bf16.mxu1 %v966_v0  ;;  %v792_v2 = vld [vmem:[#allocation3 + $0xc] ss:$16 sps:$4 sm:$0xff]   ;;  %v794_v3 = vld [vmem:[#allocation3] ss:$16 sps:$4 sm:$0xff]   ;;  %v795_v4 = vld [vmem:[#allocation3 + $0x8] ss:$16 sps:$4 sm:$0xff]  }
  0x28   :  { %243 = vmatprep.subr.bf16.mxu0 %v790_v1  ;;  %284 = vmatprep.subr.bf16.mxu1 %v792_v2  ;;  %v796_v5 = vld [vmem:[#allocation3 + $0x24] ss:$16 sps:$4 sm:$0xff]   ;;  %v798_v6 = vld [vmem:[#allocation3 + $0x2c] ss:$16 sps:$4 sm:$0xff]   ;;  %v800_v7 = vld [vmem:[#allocation3 + $0x20] ss:$16 sps:$4 sm:$0xff]  }
  0x29   :  { %244 = vmatpush1.bf16.msra.mxu0 %v794_v3  ;;  %285 = vmatpush1.bf16.msra.mxu1 %v795_v4  ;;  %v801_v8 = vld [vmem:[#allocation3 + $0x28] ss:$16 sps:$4 sm:$0xff]   ;;  %v802_v9 = vld [vmem:[#allocation3 + $0x44] ss:$16 sps:$4 sm:$0xff]   ;;  %v804_v10 = vld [vmem:[#allocation3 + $0x4c] ss:$16 sps:$4 sm:$0xff]  }
  0x2a   :  { %245 = vmatprep.subr.bf16.mxu0 %v796_v5  ;;  %286 = vmatprep.subr.bf16.mxu1 %v798_v6  ;;  %v806_v11 = vld [vmem:[#allocation3 + $0x40] ss:$16 sps:$4 sm:$0xff]   ;;  %v807_v12 = vld [vmem:[#allocation3 + $0x48] ss:$16 sps:$4 sm:$0xff]   ;;  %v808_v13 = vld [vmem:[#allocation3 + $0x64] ss:$16 sps:$4 sm:$0xff]   ;;  %v334_v6 = vlaneseq }
  0x2b   :  { %v810_v14 = vld [vmem:[#allocation3 + $0x6c] ss:$16 sps:$4 sm:$0xff]   ;;  %v812_v15 = vld [vmem:[#allocation3 + $0x60] ss:$16 sps:$4 sm:$0xff]   ;;  %v813_v16 = vld [vmem:[#allocation3 + $0x68] ss:$16 sps:$4 sm:$0xff]  }
  0x2c   :  { %v814_v17 = vld [vmem:[#allocation3 + $0x84] ss:$16 sps:$4 sm:$0xff]   ;;  %v816_v18 = vld [vmem:[#allocation3 + $0x8c] ss:$16 sps:$4 sm:$0xff]   ;;  %v818_v19 = vld [vmem:[#allocation3 + $0x80] ss:$16 sps:$4 sm:$0xff]  }
  0x2d   :  { %246 = vmatpush1.bf16.msra.mxu0 %v800_v7  ;;  %287 = vmatpush1.bf16.msra.mxu1 %v801_v8  ;;  %v819_v20 = vld [vmem:[#allocation3 + $0x88] ss:$16 sps:$4 sm:$0xff]   ;;  %v820_v21 = vld [vmem:[#allocation3 + $0xa4] ss:$16 sps:$4 sm:$0xff]   ;;  %v822_v22 = vld [vmem:[#allocation3 + $0xac] ss:$16 sps:$4 sm:$0xff]  }
  0x2e   :  { %247 = vmatprep.subr.bf16.mxu0 %v802_v9  ;;  %288 = vmatprep.subr.bf16.mxu1 %v804_v10  ;;  %v824_v23 = vld [vmem:[#allocation3 + $0xa0] ss:$16 sps:$4 sm:$0xff]   ;;  %v825_v24 = vld [vmem:[#allocation3 + $0xa8] ss:$16 sps:$4 sm:$0xff]   ;;  %v826_v25 = vld [vmem:[#allocation3 + $0xc4] ss:$16 sps:$4 sm:$0xff]  }
  0x2f   :  { %v828_v26 = vld [vmem:[#allocation3 + $0xcc] ss:$16 sps:$4 sm:$0xff]   ;;  %v830_v27 = vld [vmem:[#allocation3 + $0xc0] ss:$16 sps:$4 sm:$0xff]   ;;  %v831_v28 = vld [vmem:[#allocation3 + $0xc8] ss:$16 sps:$4 sm:$0xff]  }
  0x30   :  { %v832_v29 = vld [vmem:[#allocation3 + $0xe4] ss:$16 sps:$4 sm:$0xff]   ;;  %v834_v30 = vld [vmem:[#allocation3 + $0xec] ss:$16 sps:$4 sm:$0xff]   ;;  %v836_v31 = vld [vmem:[#allocation3 + $0xe0] ss:$16 sps:$4 sm:$0xff]  }
  0x31   :  { %248 = vmatpush1.bf16.msra.mxu0 %v806_v11  ;;  %289 = vmatpush1.bf16.msra.mxu1 %v807_v12  ;;  %v837_v32 = vld [vmem:[#allocation3 + $0xe8] ss:$16 sps:$4 sm:$0xff]   ;;  %v840_v33 = vld [vmem:[#allocation6 + $0x4] ss:$16 sps:$4 sm:$0xff]   ;;  %v843_v34 = vld [vmem:[#allocation6 + $0xc] ss:$16 sps:$4 sm:$0xff]  }
  0x32   :  { %249 = vmatprep.subr.bf16.mxu0 %v808_v13  ;;  %290 = vmatprep.subr.bf16.mxu1 %v810_v14  ;;  %v50_v35 = vld [vmem:[%s1050_s2] sm:$0x1]  ;;  %v838_v36 = vld [vmem:[#allocation6] ss:$16 sps:$4 sm:$0xff]   ;;  %v841_v37 = vld [vmem:[#allocation6 + $0x8] ss:$16 sps:$4 sm:$0xff]  }
  0x33   :  { %v846_v38 = vld [vmem:[#allocation6 + $0x24] ss:$16 sps:$4 sm:$0xff]   ;;  %v849_v39 = vld [vmem:[#allocation6 + $0x2c] ss:$16 sps:$4 sm:$0xff]   ;;  %v844_v40 = vld [vmem:[#allocation6 + $0x20] ss:$16 sps:$4 sm:$0xff]  }
  0x34   :  { %v847_v41 = vld [vmem:[#allocation6 + $0x28] ss:$16 sps:$4 sm:$0xff]   ;;  %v852_v42 = vld [vmem:[#allocation6 + $0x44] ss:$16 sps:$4 sm:$0xff]   ;;  %v855_v43 = vld [vmem:[#allocation6 + $0x4c] ss:$16 sps:$4 sm:$0xff]  }
  0x35   :  { %250 = vmatpush1.bf16.msra.mxu0 %v812_v15  ;;  %291 = vmatpush1.bf16.msra.mxu1 %v813_v16  ;;  %v850_v44 = vld [vmem:[#allocation6 + $0x40] ss:$16 sps:$4 sm:$0xff]   ;;  %v853_v45 = vld [vmem:[#allocation6 + $0x48] ss:$16 sps:$4 sm:$0xff]   ;;  %v858_v46 = vld [vmem:[#allocation6 + $0x64] ss:$16 sps:$4 sm:$0xff]  }
  0x36   :  { %251 = vmatprep.subr.bf16.mxu0 %v814_v17  ;;  %292 = vmatprep.subr.bf16.mxu1 %v816_v18  ;;  %v861_v47 = vld [vmem:[#allocation6 + $0x6c] ss:$16 sps:$4 sm:$0xff]   ;;  %v856_v48 = vld [vmem:[#allocation6 + $0x60] ss:$16 sps:$4 sm:$0xff]   ;;  %v859_v49 = vld [vmem:[#allocation6 + $0x68] ss:$16 sps:$4 sm:$0xff]  }
  0x37   :  { %v864_v50 = vld [vmem:[#allocation6 + $0x84] ss:$16 sps:$4 sm:$0xff]   ;;  %v867_v51 = vld [vmem:[#allocation6 + $0x8c] ss:$16 sps:$4 sm:$0xff]   ;;  %v862_v52 = vld [vmem:[#allocation6 + $0x80] ss:$16 sps:$4 sm:$0xff]  }
  0x38   :  { %v865_v53 = vld [vmem:[#allocation6 + $0x88] ss:$16 sps:$4 sm:$0xff]   ;;  %v870_v54 = vld [vmem:[#allocation6 + $0xa4] ss:$16 sps:$4 sm:$0xff]   ;;  %v873_v55 = vld [vmem:[#allocation6 + $0xac] ss:$16 sps:$4 sm:$0xff]  }
  0x39   :  { %252 = vmatpush1.bf16.msra.mxu0 %v818_v19  ;;  %293 = vmatpush1.bf16.msra.mxu1 %v819_v20  ;;  %v868_v56 = vld [vmem:[#allocation6 + $0xa0] ss:$16 sps:$4 sm:$0xff]   ;;  %v871_v57 = vld [vmem:[#allocation6 + $0xa8] ss:$16 sps:$4 sm:$0xff]   ;;  %v876_v58 = vld [vmem:[#allocation6 + $0xc4] ss:$16 sps:$4 sm:$0xff]  }
  0x3a   :  { %253 = vmatprep.subr.bf16.mxu0 %v820_v21  ;;  %294 = vmatprep.subr.bf16.mxu1 %v822_v22  ;;  %v879_v59 = vld [vmem:[#allocation6 + $0xcc] ss:$16 sps:$4 sm:$0xff]   ;;  %v874_v60 = vld [vmem:[#allocation6 + $0xc0] ss:$16 sps:$4 sm:$0xff]   ;;  %v877_v61 = vld [vmem:[#allocation6 + $0xc8] ss:$16 sps:$4 sm:$0xff]  }
  0x3b   :  { %v882_v62 = vld [vmem:[#allocation6 + $0xe4] ss:$16 sps:$4 sm:$0xff]   ;;  %v885_v63 = vld [vmem:[#allocation6 + $0xec] ss:$16 sps:$4 sm:$0xff]   ;;  %v883_v1 = vld [vmem:[#allocation6 + $0xe8] ss:$16 sps:$4 sm:$0xff]  }
  0x3c   :  { %v359_v2 = vld [vmem:[%s1051_s3] sm:$0x1]  ;;  %v967_v4 = vmov 1966171168   ;;  %v335_v8 = vshrl.u32 %v334_v6, 7  ;;  %vm356_vm0 = vcmp.lt.s32.totalorder %v334_v6, 512 }
  0x3d   :  { %254 = vmatpush1.bf16.msra.mxu0 %v824_v23  ;;  %295 = vmatpush1.bf16.msra.mxu1 %v825_v24  ;;  %v361_v3 = vpack.c.bf16 %v359_v2, %v359_v2  ;;  %v332_v5 = vunpack.c.l.s4 %v967_v4  ;;  %vm699_vm2 = vcmask 0  }
  0x3e   :  { %255 = vmatprep.subr.bf16.mxu0 %v826_v25  ;;  %296 = vmatprep.subr.bf16.mxu1 %v828_v26 }
  0x3f   :  { %v333_v7 = vunpack.c.0.s8 %v332_v5 }
  0x41   :  { %256 = vmatpush1.bf16.msra.mxu0 %v830_v27  ;;  %297 = vmatpush1.bf16.msra.mxu1 %v831_v28  ;;  %v336_v11 = vsub.s32 %v333_v7, %v335_v8 }
  0x42   :  { %257 = vmatprep.subr.bf16.mxu0 %v832_v29  ;;  %298 = vmatprep.subr.bf16.mxu1 %v834_v30 }
  0x45   :  { %258 = vmatpush1.bf16.msra.mxu0 %v836_v31  ;;  %299 = vmatpush1.bf16.msra.mxu1 %v837_v32 }
  0x46   :  { %554 = vmatprep.subr.bf16.mxu0 %v840_v33  ;;  %595 = vmatprep.subr.bf16.mxu1 %v843_v34 }
  0x48   :  { %276 = vmatmul.mubr.bf16.vlgmr.msra.gmra.mrb[0].mxu0 %v50_v35  ;;  %317 = vmatmul.mubr.bf16.vlgmr.msra.gmra.mrb[0].mxu1 %v50_v35 }
  0x49   :  { %555 = vmatpush1.bf16.msra.mxu0 %v838_v36  ;;  %596 = vmatpush1.bf16.msra.mxu1 %v841_v37 }
  0x4a   :  { %556 = vmatprep.subr.bf16.mxu0 %v846_v38  ;;  %597 = vmatprep.subr.bf16.mxu1 %v849_v39 }
  0x4b   :  { %586 = vmatprep.mubr.bf16.mxu0 %v966_v0  ;;  %627 = vmatprep.mubr.bf16.mxu1 %v966_v0  ;;  %v880_v0 = vld [vmem:[#allocation6 + $0xe0] ss:$16 sps:$4 sm:$0xff]  }
  0x4d   :  { %557 = vmatpush1.bf16.msra.mxu0 %v844_v40  ;;  %598 = vmatpush1.bf16.msra.mxu1 %v847_v41 }
  0x4e   :  { %558 = vmatprep.subr.bf16.mxu0 %v852_v42  ;;  %599 = vmatprep.subr.bf16.mxu1 %v855_v43 }
  0x51   :  { %559 = vmatpush1.bf16.msra.mxu0 %v850_v44  ;;  %600 = vmatpush1.bf16.msra.mxu1 %v853_v45  ;;  %v360_v45 = vld [vmem:[%s1052_s4] sm:$0x1]  ;;  %s968_s4 = smov [#allocation8]  }
  0x52   :  { %560 = vmatprep.subr.bf16.mxu0 %v858_v46  ;;  %601 = vmatprep.subr.bf16.mxu1 %v861_v47  ;;  %s707_s21 = sshll.u32 %s968_s4, 4  ;;  %s708_s21 = int_to_ptr.vmem [resolvable:$true] %s707_s21 }
  0x53   :  { %s934_s23 = scalar_lea.vmem %s708_s21, 16  ;;  %s938_s24 = scalar_lea.vmem %s708_s21, 32 }
  0x54   :  { %p935_p2 = scmp.ne.s32.totalorder %s708_s21, %s934_s23  ;;  %p939_p3 = scmp.lt.s32.totalorder %s708_s21, %s708_s21 }
  0x55   :  { %561 = vmatpush1.bf16.msra.mxu0 %v856_v48  ;;  %602 = vmatpush1.bf16.msra.mxu1 %v859_v49  ;;  %p940_p4 = scmp.lt.s32.totalorder %s938_s24, %s934_s23 }
  0x56   :  { %562 = vmatprep.subr.bf16.mxu0 %v864_v50  ;;  %603 = vmatprep.subr.bf16.mxu1 %v867_v51 }
  0x57   :  { %p941_p5 = por %p940_p4, %p939_p3 }
  0x59   :  { %563 = vmatpush1.bf16.msra.mxu0 %v862_v52  ;;  %604 = vmatpush1.bf16.msra.mxu1 %v865_v53  ;;  %p942_p6 = pnand %p941_p5, %p935_p2 }
  0x5a   :  { %564 = vmatprep.subr.bf16.mxu0 %v870_v54  ;;  %605 = vmatprep.subr.bf16.mxu1 %v873_v55 }
  0x5d   :  { %565 = vmatpush1.bf16.msra.mxu0 %v868_v56  ;;  %606 = vmatpush1.bf16.msra.mxu1 %v871_v57 }
  0x5e   :  { %566 = vmatprep.subr.bf16.mxu0 %v876_v58  ;;  %607 = vmatprep.subr.bf16.mxu1 %v879_v59 }
  0x61   :  { %567 = vmatpush1.bf16.msra.mxu0 %v874_v60  ;;  %608 = vmatpush1.bf16.msra.mxu1 %v877_v61 }
  0x62   :  { %568 = vmatprep.subr.bf16.mxu0 %v882_v62  ;;  %609 = vmatprep.subr.bf16.mxu1 %v885_v63 }
  0x65   :  { %569 = vmatpush1.bf16.msra.mxu0 %v880_v0  ;;  %610 = vmatpush1.bf16.msra.mxu1 %v883_v1 }
  0x68   :  { %587 = vmatmul.mubr.bf16.vlgmr.msra.gmra.mrb[4].mxu0 %v361_v3  ;;  %628 = vmatmul.mubr.bf16.vlgmr.msra.gmra.mrb[4].mxu1 %v361_v3 }
 0x11b   :  { %v277_v9 = vpop.f32.mrb[0].mxu0  ;;  %v318_v10 = vpop.f32.mrb[0].mxu1 }
 0x11c   :  { %v279_v12 = vpop.f32.mrb[1].mxu0  ;;  %v320_v13 = vpop.f32.mrb[1].mxu1 }
 0x11d   :  { %v329_v14 = vcombine.low %v277_v9, %v279_v12  ;;  %v330_v15 = vcombine.low %v318_v10, %v320_v13  ;;  %v281_v16 = vpop.f32.mrb[2].mxu0  ;;  %v322_v17 = vpop.f32.mrb[2].mxu1 }
 0x11e   :  { %v282_v18 = vpop.f32.mrb[3].mxu0  ;;  %v323_v19 = vpop.f32.mrb[3].mxu1 }
 0x11f   :  { %v337_v20 = vrot.slane %v329_v14, %v336_v11  ;;  %v344_v21 = vrot.slane %v330_v15, %v336_v11 }
 0x121   :  { %v345_v22 = vcombine.low %v337_v20, %v344_v21 }
 0x123   :  { %v352_v23 = vrot.slane %v345_v22, %v336_v11 }
 0x125   :  { %358 = vst.msk [vmem:[#allocation2] sm:$0xf] %vm356_vm0, %v352_v23 }
 0x12c   :  { %v636_v38 = vld [vmem:[#allocation2] sm:$0xf] }
 0x13b   :  { %v588_v24 = vpop.f32.mrb[4].mxu0  ;;  %v629_v25 = vpop.f32.mrb[4].mxu1 }
 0x13c   :  { %v590_v26 = vpop.f32.mrb[5].mxu0  ;;  %v631_v27 = vpop.f32.mrb[5].mxu1 }
 0x13d   :  { %v641_v28 = vcombine.low %v588_v24, %v590_v26  ;;  %v642_v29 = vcombine.low %v629_v25, %v631_v27  ;;  %v592_v30 = vpop.f32.mrb[6].mxu0  ;;  %v633_v31 = vpop.f32.mrb[6].mxu1 }
 0x13e   :  { %v593_v32 = vpop.f32.mrb[7].mxu0  ;;  %v634_v33 = vpop.f32.mrb[7].mxu1 }
 0x13f   :  { %v649_v34 = vrot.slane %v641_v28, %v336_v11  ;;  %v656_v35 = vrot.slane %v642_v29, %v336_v11 }
 0x141   :  { %v657_v36 = vcombine.low %v649_v34, %v656_v35 }
 0x143   :  { %v664_v37 = vrot.slane %v657_v36, %v336_v11 }
 0x145   :  { %v666_v39 = vadd.f32 %v664_v37, %v636_v38 }
 0x147   :  { %886 = vtanh.f32 %v666_v39 }
 0x151   :  { %v887_v40 = vpop.eup %886 }
 0x152   :  { %v668_v41 = vmul.f32 0.5, %v887_v40  ;;  %v671_v42 = vrot.slane %v887_v40, 1  ;;  %v680_v47 = vrot.slane %v887_v40, 2  ;;  %v675_v51 = vrot.slane %v887_v40, 3 }
 0x154   :  { %v669_v43 = vadd.f32 0.5, %v668_v41  ;;  %v673_v44 = vmul.f32 0.5, %v671_v42  ;;  %v677_v52 = vmul.f32 0.5, %v675_v51 }
 0x156   :  { %v674_v46 = vadd.f32 0.5, %v673_v44  ;;  %v682_v49 = vmul.f32 %v680_v47, %v669_v43  ;;  %v678_v53 = vadd.f32 0.5, %v677_v52 }
 0x158   :  { %v679_v48 = vmul.f32 %v674_v46, %v360_v45 }
 0x15a   :  { %v683_v50 = vadd.f32 %v682_v49, %v679_v48 }
 0x15c   :  { %888 = vtanh.f32 %v683_v50 }
 0x166   :  { %v889_v54 = vpop.eup %888 }
 0x167   :  { %v685_v55 = vmul.f32 %v889_v54, %v678_v53 }
 0x169   :  { %v686_v56 = vadd.f32 %v685_v55, %v683_v50 }
 0x16b   :  { %v688_v57 = vsel %vm687_vm1, %v686_v56, 0.0 }
 0x16c   :  { %689 = vadd.xlane.f32.xlu0 %v688_v57 }
 0x1f9   :  { %v690_v58 = vpop.xlane.xlu0 %689 }
 0x1fa   :  { %v691_v59 = vrot.slane %v690_v58, 4 }
 0x1fc   :  { %v692_v60 = vadd.f32 %v691_v59, %v690_v58 }
 0x1fe   :  { %v693_v61 = vrot.slane %v692_v60, 2 }
 0x200   :  { %v694_v62 = vadd.f32 %v693_v61, %v692_v60 }
 0x202   :  { %v695_v63 = vrot.slane %v694_v62, 1 }
 0x204   :  { %v696_v0 = vadd.f32 %v695_v63, %v694_v62 }
 0x206   :  { %781 = vpush %v696_v0 }
 0x237   :  { %s782_s22 = spop %781 }
 0x238   :  { %v698_v1 = vstv %s782_s22 }
 0x239   :  { %700 = vst.msk [vmem:[#allocation8] sm:$0x1] %vm699_vm2, %v698_v1 }
 0x23a   :  { %945 = shalt.err (!%p942_p6)
}
 0x23b   :  { %s946_s27 = scalar_lea.hbm %s1053_s5, 16 }
 0x23c   :  { %p947_p7 = scmp.ne.s32.totalorder %s1053_s5, %s946_s27  ;;  %p950_p8 = scmp.lt.u32.totalorder %s946_s27, %s1053_s5 }
 0x23e   :  { %p952_p9 = pnand %p950_p8, %p947_p7 }
 0x240   :  { %955 = shalt.err (!%p952_p9)
}
 0x241   :  { %710 = dma.vmem_to_hbm [thread:$0]  %s708_s21, 16, %s1053_s5, [#allocation5]  }
 0x242   :  { %960 = dma.done.wait [#allocation5], 16  }
 0x243   :  { %961 = vsyncadd [#allocation5], 4294967280 }
 0x244   :  { %714 = vsyncpa [#allocation4], 1 }
 0x245   :  { %715 = vsyncpa [#allocation7], 1 }
 0x246   :  { %716 = vsyncpa [#allocation5], 1 }

</bundles_post_ra>
